<compile_context>
chip_gen: v7x
topology: tpu7x:2x2x1
jax: 0.10.0
libtpu: 0.0.40
codegen_flags: <defaults>
</compile_context>

<pallas_src>
import jax
import jax.numpy as jnp
from jax.experimental import pallas as pl
from jax.experimental.pallas import tpu as pltpu


def mlp_kernel(x_ref, w1_ref, b1_ref, w2_ref, b2_ref, o_ref):
    # fc1 + ReLU: cast activations to bf16 in-kernel (no wrapper HBM pass),
    # MXU matmul with f32 accumulation, f32 bias + ReLU on the VPU.
    x = x_ref[...].astype(jnp.bfloat16)                              # (TILE_B, IN)
    h = jnp.dot(x, w1_ref[...], preferred_element_type=jnp.float32)  # (TILE_B, HID_p)
    h = jnp.maximum(h + b1_ref[...], 0.0)                            # b1: (1, HID_p) f32
    # fc2: activations back to bf16 for the MXU, accumulate in f32.
    y = jnp.dot(h.astype(jnp.bfloat16), w2_ref[...],
                preferred_element_type=jnp.float32)                  # (TILE_B, OUT_p)
    y = y + b2_ref[...]                                              # b2: (1, OUT_p) f32
    # Keep only the real output lanes; sigmoid via EUP exp + approx reciprocal.
    out_w = o_ref.shape[-1]
    y = y[:, :out_w]
    o_ref[...] = pl.reciprocal(1.0 + jnp.exp(-y), approx=True)


def _round_up(x, m):
    return ((x + m - 1) // m) * m


def _cdiv(a, b):
    return -(-a // b)


def _vmem_need_bytes(tile_b, input_size, hid_p, out_p, output_size, x_itemsize):
    """Rough upper bound on VMEM footprint of one pipelined grid step."""
    x_bufs = 2 * tile_b * input_size * x_itemsize          # double-buffered input tile
    out_bufs = 2 * tile_b * output_size * 4                # double-buffered output tile
    weights = ((input_size * hid_p + hid_p * out_p) * 2    # bf16 weights
               + (hid_p + out_p) * 4) * 2                  # f32 biases; x2 for pipeline bufs
    # in-kernel temporaries: x bf16 cast, h f32, h bf16, y f32
    temps = tile_b * (input_size * 2 + hid_p * (4 + 2) + out_p * 4)
    return x_bufs + out_bufs + weights + temps


def prepare_params(w1, b1, w2, b2):
    """One-time (hoisted out of the forward path) padding + bf16 cast of weights.

    w1: (input_size, hidden), w2: (hidden, output).  Hidden/output feature dims
    are zero-padded to lane-dense widths (multiples of 128); the K (input) dim
    is left untouched since it is never tiled.  Zero padding is exact: padded
    hidden units have zero weights + bias, ReLU(0)=0 feeds zero rows of W2, and
    padded output lanes are sliced off inside the kernel before the store.
    """
    input_size, hidden_size = w1.shape
    output_size = w2.shape[1]
    hid_p = _round_up(hidden_size, 128)
    out_p = _round_up(output_size, 128)

    w1_p = jnp.zeros((input_size, hid_p), jnp.bfloat16).at[:, :hidden_size].set(
        w1.astype(jnp.bfloat16))
    b1_p = jnp.zeros((1, hid_p), jnp.float32).at[0, :hidden_size].set(
        b1.astype(jnp.float32))
    w2_p = jnp.zeros((hid_p, out_p), jnp.bfloat16).at[:hidden_size, :output_size].set(
        w2.astype(jnp.bfloat16))
    b2_p = jnp.zeros((1, out_p), jnp.float32).at[0, :output_size].set(
        b2.astype(jnp.float32))

    return {
        "w1": w1_p, "b1": b1_p, "w2": w2_p, "b2": b2_p,
        "input_size": input_size,
        "hidden_size": hidden_size,
        "output_size": output_size,
    }


def mlp_classifier_forward(x_nchw, params, *, tile_b_max=2048):
    """x_nchw: (B, C, H, W); params from prepare_params().
    Returns sigmoid(relu(flatten(x) @ w1 + b1) @ w2 + b2), shape (B, output_size), f32."""
    B = x_nchw.shape[0]
    input_size = params["input_size"]
    output_size = params["output_size"]
    w1_p, b1_p, w2_p, b2_p = params["w1"], params["b1"], params["w2"], params["b2"]
    hid_p = w1_p.shape[1]
    out_p = w2_p.shape[1]

    # nn.Flatten(start_dim=1): row-major flatten of (C, H, W).  No cast/copy here.
    x_flat = x_nchw.reshape(B, input_size)
    x_itemsize = x_flat.dtype.itemsize

    # --- Batch tiling: minimize padding, keep the per-step VMEM budget sane. ---
    if B <= tile_b_max:
        tile_b = B                       # block == full array dim -> always legal, zero pad
    else:
        n_tiles = _cdiv(B, tile_b_max)
        tile_b = _round_up(_cdiv(B, n_tiles), 8)   # minimal sublane-aligned tile

    VMEM_TARGET = 40 * 1024 * 1024       # comfortable under v7x's 64 MiB/TC physical VMEM
    while tile_b > 8 and _vmem_need_bytes(tile_b, input_size, hid_p, out_p,
                                          output_size, x_itemsize) > VMEM_TARGET:
        tile_b = max(8, _round_up(tile_b // 2, 8))

    n_tiles = _cdiv(B, tile_b)
    b_p = n_tiles * tile_b

    if b_p == B:
        x_in = x_flat                    # fast path: no wrapper copy at all
    else:
        # Fallback only when the batch genuinely needs padding (zero rows are
        # sliced off below; they never affect real rows).
        x_in = jnp.zeros((b_p, input_size), x_flat.dtype).at[:B].set(x_flat)

    need = _vmem_need_bytes(tile_b, input_size, hid_p, out_p, output_size, x_itemsize)
    vmem_limit = int(min(max(need + (8 << 20), 32 << 20), 100 << 20))

    flops = 2 * b_p * (input_size * hid_p + hid_p * out_p)
    bytes_accessed = (b_p * input_size * x_itemsize
                      + w1_p.size * 2 + w2_p.size * 2
                      + b1_p.size * 4 + b2_p.size * 4
                      + b_p * output_size * 4)

    out = pl.pallas_call(
        mlp_kernel,
        out_shape=jax.ShapeDtypeStruct((b_p, output_size), jnp.float32),
        grid=(n_tiles,),
        in_specs=[
            pl.BlockSpec((tile_b, input_size), lambda i: (i, 0)),  # x: tiled over batch
            pl.BlockSpec((input_size, hid_p), lambda i: (0, 0)),   # W1: resident
            pl.BlockSpec((1, hid_p), lambda i: (0, 0)),            # b1: resident
            pl.BlockSpec((hid_p, out_p), lambda i: (0, 0)),        # W2: resident
            pl.BlockSpec((1, out_p), lambda i: (0, 0)),            # b2: resident
        ],
        # Narrow output: last block dim equals the full array dim -> legal; only
        # the real output lanes ever hit HBM.
        out_specs=pl.BlockSpec((tile_b, output_size), lambda i: (i, 0)),
        compiler_params=pltpu.CompilerParams(
            dimension_semantics=("parallel",),
            vmem_limit_bytes=vmem_limit),
        cost_estimate=pl.CostEstimate(
            flops=flops,
            transcendentals=b_p * output_size,
            bytes_accessed=bytes_accessed),
    )(x_in, w1_p, b1_p, w2_p, b2_p)

    return out if b_p == B else out[:B]


def init_params(key, input_size, hidden_size, output_size):
    """Deterministic init mimicking nn.Linear's U(-1/sqrt(fan_in), 1/sqrt(fan_in))."""
    k1, k2, k3, k4 = jax.random.split(key, 4)
    bound1 = 1.0 / jnp.sqrt(float(input_size))
    bound2 = 1.0 / jnp.sqrt(float(hidden_size))
    w1 = jax.random.uniform(k1, (input_size, hidden_size), jnp.float32,
                            minval=-bound1, maxval=bound1)
    b1 = jax.random.uniform(k2, (hidden_size,), jnp.float32,
                            minval=-bound1, maxval=bound1)
    w2 = jax.random.uniform(k3, (hidden_size, output_size), jnp.float32,
                            minval=-bound2, maxval=bound2)
    b2 = jax.random.uniform(k4, (output_size,), jnp.float32,
                            minval=-bound2, maxval=bound2)
    return w1, b1, w2, b2


if __name__ == "__main__":
    # Small shapes consistent with the module: NCHW input flattened into
    # input_size = C*H*W features.
    B, C, H, W = 2, 4, 16, 16
    input_size = C * H * W          # 1024
    hidden_size = 32
    output_size = 2

    key = jax.random.PRNGKey(0)
    kx, kp = jax.random.split(key)
    x = jax.random.normal(kx, (B, C, H, W), jnp.float32)
    w1, b1, w2, b2 = init_params(kp, input_size, hidden_size, output_size)

    # One-time weight prep (padding + bf16 cast hoisted out of the forward path).
    params = prepare_params(w1, b1, w2, b2)

    out = mlp_classifier_forward(x, params)
    out = jax.block_until_ready(out)

    # Cross-check against a pure-JAX f32 reference (same math as the PyTorch
    # forward).  Tolerance covers the intentional bf16 matmul inputs and the
    # approximate EUP reciprocal in the sigmoid.
    x_flat = x.reshape(B, input_size)
    ref = jax.nn.sigmoid(jnp.maximum(x_flat @ w1 + b1, 0.0) @ w2 + b2)
    assert out.shape == (B, output_size)
    assert jnp.allclose(out, ref, atol=1e-2, rtol=1e-2)

    print("KERNEL_OK")
</pallas_src>

<mosaic_0001>
module attributes {stable_mosaic.version = 11 : i64} {
  func.func @mlp_kernel(%arg0: i32, %arg1: memref<2x1024xf32, #tpu.memory_space<vmem>>, %arg2: memref<1024x128xbf16, #tpu.memory_space<vmem>>, %arg3: memref<1x128xf32, #tpu.memory_space<vmem>>, %arg4: memref<128x128xbf16, #tpu.memory_space<vmem>>, %arg5: memref<1x128xf32, #tpu.memory_space<vmem>>, %arg6: memref<2x2xf32, #tpu.memory_space<vmem>>) attributes {dimension_semantics = [#tpu.dimension_semantics<parallel>], iteration_bounds = array<i64: 1>, scalar_prefetch = 0 : i64, scratch_operands = 0 : i64, tpu.core_type = #tpu.core_type<tc>, window_params = [{transform_indices = @transform_0, window_bounds = array<i64: 2, 1024>}, {pipeline_mode = #tpu.pipeline_mode<synchronous>, transform_indices = @transform_1, window_bounds = array<i64: 1024, 128>}, {pipeline_mode = #tpu.pipeline_mode<synchronous>, transform_indices = @transform_2, window_bounds = array<i64: 1, 128>}, {pipeline_mode = #tpu.pipeline_mode<synchronous>, transform_indices = @transform_3, window_bounds = array<i64: 128, 128>}, {pipeline_mode = #tpu.pipeline_mode<synchronous>, transform_indices = @transform_4, window_bounds = array<i64: 1, 128>}, {transform_indices = @transform_5, window_bounds = array<i64: 2, 2>}]} {
    %c0 = arith.constant 0 : index
    %c0_0 = arith.constant 0 : index
    %0 = vector.load %arg1[%c0, %c0_0] : memref<2x1024xf32, #tpu.memory_space<vmem>>, vector<2x1024xf32>
    %1 = arith.truncf %0 : vector<2x1024xf32> to vector<2x1024xbf16>
    %c0_1 = arith.constant 0 : index
    %c0_2 = arith.constant 0 : index
    %2 = vector.load %arg2[%c0_1, %c0_2] : memref<1024x128xbf16, #tpu.memory_space<vmem>>, vector<1024x128xbf16>
    %cst = arith.constant dense<0.000000e+00> : vector<2x128xf32>
    %3 = tpu.matmul %1, %2, %cst {dimension_numbers = #tpu.dot_dimension_numbers<[1], [0], [0], [1], [0, 0, 1, 1], [], []>} : vector<2x1024xbf16>, vector<1024x128xbf16>, vector<2x128xf32> -> vector<2x128xf32>
    %c0_3 = arith.constant 0 : index
    %c0_4 = arith.constant 0 : index
    %4 = vector.load %arg3[%c0_3, %c0_4] : memref<1x128xf32, #tpu.memory_space<vmem>>, vector<1x128xf32>
    %5 = vector.broadcast %4 : vector<1x128xf32> to vector<2x128xf32>
    %6 = arith.addf %3, %5 : vector<2x128xf32>
    %cst_5 = arith.constant 0.000000e+00 : f32
    %7 = vector.broadcast %cst_5 : f32 to vector<2x128xf32>
    %8 = arith.maximumf %6, %7 : vector<2x128xf32>
    %9 = arith.truncf %8 : vector<2x128xf32> to vector<2x128xbf16>
    %c0_6 = arith.constant 0 : index
    %c0_7 = arith.constant 0 : index
    %10 = vector.load %arg4[%c0_6, %c0_7] : memref<128x128xbf16, #tpu.memory_space<vmem>>, vector<128x128xbf16>
    %cst_8 = arith.constant dense<0.000000e+00> : vector<2x128xf32>
    %11 = tpu.matmul %9, %10, %cst_8 {dimension_numbers = #tpu.dot_dimension_numbers<[1], [0], [0], [1], [0, 0, 1, 1], [], []>} : vector<2x128xbf16>, vector<128x128xbf16>, vector<2x128xf32> -> vector<2x128xf32>
    %c0_9 = arith.constant 0 : index
    %c0_10 = arith.constant 0 : index
    %12 = vector.load %arg5[%c0_9, %c0_10] : memref<1x128xf32, #tpu.memory_space<vmem>>, vector<1x128xf32>
    %13 = vector.broadcast %12 : vector<1x128xf32> to vector<2x128xf32>
    %14 = arith.addf %11, %13 : vector<2x128xf32>
    %15 = vector.extract_strided_slice %14 {offsets = [0, 0], sizes = [2, 2], strides = [1, 1]} : vector<2x128xf32> to vector<2x2xf32>
    %cst_11 = arith.constant 0.000000e+00 : f32
    %16 = vector.broadcast %cst_11 : f32 to vector<2x2xf32>
    %17 = arith.subf %16, %15 : vector<2x2xf32>
    %18 = math.exp %17 : vector<2x2xf32>
    %cst_12 = arith.constant 1.000000e+00 : f32
    %19 = vector.broadcast %cst_12 : f32 to vector<2x2xf32>
    %20 = arith.addf %19, %18 : vector<2x2xf32>
    %21 = tpu.reciprocal %20 {approx = true} : vector<2x2xf32> -> vector<2x2xf32>
    %c0_13 = arith.constant 0 : index
    %c0_14 = arith.constant 0 : index
    %22 = vector.load %arg6[%c0_13, %c0_14] : memref<2x2xf32, #tpu.memory_space<vmem>>, vector<2x2xf32>
    tpu.vector_store %arg6[%c0_13, %c0_14], %21 {strides = array<i32>} : memref<2x2xf32, #tpu.memory_space<vmem>>, vector<2x2xf32>,
    return
  }
  func.func @transform_0(%arg0: i32) -> (i32, i32) {
    %c0_i32 = arith.constant 0 : i32
    %c0_i32_0 = arith.constant 0 : i32
    return %arg0, %c0_i32 : i32, i32
  }
  func.func @transform_1(%arg0: i32) -> (i32, i32) {
    %c0_i32 = arith.constant 0 : i32
    %c0_i32_0 = arith.constant 0 : i32
    %c0_i32_1 = arith.constant 0 : i32
    return %c0_i32, %c0_i32_0 : i32, i32
  }
  func.func @transform_2(%arg0: i32) -> (i32, i32) {
    %c0_i32 = arith.constant 0 : i32
    %c0_i32_0 = arith.constant 0 : i32
    %c0_i32_1 = arith.constant 0 : i32
    return %c0_i32, %c0_i32_0 : i32, i32
  }
  func.func @transform_3(%arg0: i32) -> (i32, i32) {
    %c0_i32 = arith.constant 0 : i32
    %c0_i32_0 = arith.constant 0 : i32
    %c0_i32_1 = arith.constant 0 : i32
    return %c0_i32, %c0_i32_0 : i32, i32
  }
  func.func @transform_4(%arg0: i32) -> (i32, i32) {
    %c0_i32 = arith.constant 0 : i32
    %c0_i32_0 = arith.constant 0 : i32
    %c0_i32_1 = arith.constant 0 : i32
    return %c0_i32, %c0_i32_0 : i32, i32
  }
  func.func @transform_5(%arg0: i32) -> (i32, i32) {
    %c0_i32 = arith.constant 0 : i32
    %c0_i32_0 = arith.constant 0 : i32
    return %arg0, %c0_i32 : i32, i32
  }
}

</mosaic_0001>

<bundles_post_ra>
// kernel: tpu_custom_call.1
= control target key start
LH: loop header
LB: loop body
LE: loop exit
PB: predicated region body
PF: predicated region fallthrough
CT: control target
= control target key end

     0   :  { %10 = vsyncpa [#allocation3], 0  ;;  %s1407_s0 = inlined_call_operand.hbm [shape: f32[2,1024], index: 0, kind: input, shape index: {}]   ;;  %s1408_s1 = inlined_call_operand.hbm [shape: bf16[1024,128], index: 1, kind: input, shape index: {}]   ;;  %s1409_s2 = inlined_call_operand.vmem [shape: f32[1,128], index: 2, kind: input, shape index: {}]   ;;  %s1410_s3 = inlined_call_operand.hbm [shape: bf16[128,128], index: 3, kind: input, shape index: {}]   ;;  %s1411_s4 = inlined_call_operand.vmem [shape: f32[1,128], index: 4, kind: input, shape index: {}]   ;;  %s1412_s5 = inlined_call_operand.hbm [shape: f32[2,2], index: 5, kind: output, shape index: {}]  }
   0x1   :  { %11 = vsyncpa [#allocation6], 0 }
   0x2   :  { %12 = vsyncpa [#allocation4], 0  ;;  %s1302_s18 = smov [#allocation5]   ;;  %s1208_s22 = scalar_lea.hbm %s1408_s1, 8192 }
   0x3   :  { %s28_s19 = sshll.u32 %s1302_s18, 4  ;;  %p1209_p0 = scmp.ne.s32.totalorder %s1408_s1, %s1208_s22  ;;  %s29_s19 = int_to_ptr.vmem [resolvable:$true] %s28_s19 }
   0x4   :  { %p1212_p1 = scmp.lt.u32.totalorder %s1208_s22, %s1408_s1 }
   0x6   :  { %p1214_p2 = pnand %p1212_p1, %p1209_p0 }
   0x8   :  { %1217 = shalt.err (!%p1214_p2)
}
   0x9   :  { %s1218_s27 = scalar_lea.vmem %s29_s19, 8192  ;;  %p1223_p4 = scmp.lt.s32.totalorder %s29_s19, %s29_s19 }
   0xa   :  { %p1219_p3 = scmp.ne.s32.totalorder %s29_s19, %s1218_s27  ;;  %p1224_p5 = scmp.lt.s32.totalorder %s1218_s27, %s1218_s27 }
   0xc   :  { %p1225_p6 = por %p1224_p5, %p1223_p4 }
   0xe   :  { %p1226_p7 = pnand %p1225_p6, %p1219_p3 }
  0x10   :  { %1229 = shalt.err (!%p1226_p7)
}
  0x11   :  { %s1303_s28 = smov 64   ;;  %s1304_s29 = smov 4  }
  0x12   :  { %34 = dma.hbm_to_vmem [thread:$0]  %s1408_s1, 8192, %s29_s19, [#allocation6], %s1303_s28, %s1303_s28, %s1304_s29  }
  0x13   :  { %s1305_s7 = smov [#allocation2]   ;;  %s1306_s9 = smov [#allocation7]  }
  0x14   :  { %s19_s8 = sshll.u32 %s1305_s7, 4  ;;  %s42_s10 = sshll.u32 %s1306_s9, 4  ;;  %s20_s8 = int_to_ptr.vmem [resolvable:$true] %s19_s8  ;;  %s43_s10 = int_to_ptr.vmem [resolvable:$true] %s42_s10 }
  0x15   :  { %s1230_s13 = scalar_lea.hbm %s1407_s0, 256 }
  0x16   :  { %p1231_p8 = scmp.ne.s32.totalorder %s1407_s0, %s1230_s13  ;;  %p1234_p9 = scmp.lt.u32.totalorder %s1230_s13, %s1407_s0 }
  0x18   :  { %p1236_p10 = pnand %p1234_p9, %p1231_p8 }
  0x1a   :  { %1239 = shalt.err (!%p1236_p10)
}
  0x1b   :  { %s1240_s1 = scalar_lea.vmem %s20_s8, 256  ;;  %p1245_p12 = scmp.lt.s32.totalorder %s20_s8, %s20_s8 }
  0x1c   :  { %p1241_p11 = scmp.ne.s32.totalorder %s20_s8, %s1240_s1  ;;  %p1246_p13 = scmp.lt.s32.totalorder %s1240_s1, %s1240_s1 }
  0x1e   :  { %p1247_p0 = por %p1246_p13, %p1245_p12 }
  0x20   :  { %p1248_p1 = pnand %p1247_p0, %p1241_p11 }
  0x22   :  { %1251 = shalt.err (!%p1248_p1)
}
  0x23   :  { %22 = dma.hbm_to_vmem [thread:$0]  %s1407_s0, 256, %s20_s8, [#allocation3]  }
  0x24   :  { %s1252_s22 = scalar_lea.hbm %s1410_s3, 1024 }
  0x25   :  { %p1253_p2 = scmp.ne.s32.totalorder %s1410_s3, %s1252_s22  ;;  %p1256_p3 = scmp.lt.u32.totalorder %s1252_s22, %s1410_s3 }
  0x27   :  { %p1258_p4 = pnand %p1256_p3, %p1253_p2 }
  0x29   :  { %1261 = shalt.err (!%p1258_p4)
}
  0x2a   :  { %s1262_s27 = scalar_lea.vmem %s43_s10, 1024  ;;  %p1267_p6 = scmp.lt.s32.totalorder %s43_s10, %s43_s10 }
  0x2b   :  { %p1263_p5 = scmp.ne.s32.totalorder %s43_s10, %s1262_s27  ;;  %p1268_p7 = scmp.lt.s32.totalorder %s1262_s27, %s1262_s27 }
  0x2d   :  { %p1269_p8 = por %p1268_p7, %p1267_p6 }
  0x2f   :  { %p1270_p9 = pnand %p1269_p8, %p1263_p5 }
  0x31   :  { %1273 = shalt.err (!%p1270_p9)
}
  0x32   :  { %48 = dma.hbm_to_vmem [thread:$0]  %s1410_s3, 1024, %s43_s10, [#allocation6], %s1303_s28, %s1303_s28, %s1304_s29  }
  0x33   :  { %1296 = dma.done.wait [#allocation3], 256  }
  0x34   :  { %1297 = vsyncadd [#allocation3], 4294967040 }
  0x35   :  { %1298 = dma.done.wait [#allocation6], 9216  }
  0x36   :  { %1299 = vsyncadd [#allocation6], 4294958080  ;;  %v1130_v0 = vld [vmem:[#allocation5 + $0x40] sm:$0xff]   ;;  %v1134_v4 = vld [vmem:[#allocation5 + $0x48] sm:$0xff]   ;;  %v1307_v22 = vmov 1983009808   ;;  %v69_v24 = vlaneseq }
  0x37   :  { %v1131_v1 = vld [vmem:[#allocation5 + $0xc0] sm:$0xff]   ;;  %1004 = vmatprep.subr.bf16.mxu0 %v1130_v0  ;;  %v1135_v5 = vld [vmem:[#allocation5 + $0xc8] sm:$0xff]   ;;  %v1138_v8 = vld [vmem:[#allocation5 + $0x50] sm:$0xff]   ;;  %v67_v23 = vunpack.c.l.s4 %v1307_v22  ;;  %vm1309_vm0 = vmmov 0   ;;  %s1310_s6 = smov [#allocation8]   ;;  %vm912_vm1 = vcmask 9216  }
  0x38   :  { %v1132_v2 = vld [vmem:[#allocation5] sm:$0xff]   ;;  %1026 = vmatprep.subr.bf16.mxu1 %v1131_v1  ;;  %v1136_v6 = vld [vmem:[#allocation5 + $0x8] sm:$0xff]   ;;  %v1139_v9 = vld [vmem:[#allocation5 + $0xd0] sm:$0xff]   ;;  %v70_v30 = vshrl.u32 %v69_v24, 7  ;;  %s920_s7 = sshll.u32 %s1310_s6, 4  ;;  %s921_s7 = int_to_ptr.vmem [resolvable:$true] %s920_s7 }
  0x39   :  { %v1133_v3 = vld [vmem:[#allocation5 + $0x80] sm:$0xff]   ;;  %1005 = vmatpush3.bf16.msra.mxu0 %v1132_v2  ;;  %v1137_v7 = vld [vmem:[#allocation5 + $0x88] sm:$0xff]   ;;  %v1140_v10 = vld [vmem:[#allocation5 + $0x10] sm:$0xff]   ;;  %v68_v29 = vunpack.c.0.s8 %v67_v23  ;;  %s1274_s8 = scalar_lea.vmem %s921_s7, 32  ;;  %p1279_p11 = scmp.lt.s32.totalorder %s921_s7, %s921_s7 }
  0x3a   :  { %1027 = vmatpush3.bf16.msra.mxu1 %v1133_v3  ;;  %1006 = vmatprep.subr.bf16.mxu0 %v1134_v4  ;;  %v1141_v11 = vld [vmem:[#allocation5 + $0x90] sm:$0xff]   ;;  %v1142_v12 = vld [vmem:[#allocation5 + $0x58] sm:$0xff]   ;;  %v1146_v16 = vld [vmem:[#allocation5 + $0x60] sm:$0xff]   ;;  %p1275_p10 = scmp.ne.s32.totalorder %s921_s7, %s1274_s8  ;;  %p1280_p12 = scmp.lt.s32.totalorder %s1274_s8, %s1274_s8 }
  0x3b   :  { %1028 = vmatprep.subr.bf16.mxu1 %v1135_v5  ;;  %v1143_v13 = vld [vmem:[#allocation5 + $0xd8] sm:$0xff]   ;;  %v1147_v17 = vld [vmem:[#allocation5 + $0xe0] sm:$0xff]   ;;  %v1150_v20 = vld [vmem:[#allocation5 + $0x68] sm:$0xff]   ;;  %v1383_v35 = vsub.s32 %v68_v29, %v70_v30 }
  0x3c   :  { %v1144_v14 = vld [vmem:[#allocation5 + $0x18] sm:$0xff]   ;;  %v1148_v18 = vld [vmem:[#allocation5 + $0x20] sm:$0xff]   ;;  %v1151_v21 = vld [vmem:[#allocation5 + $0xe8] sm:$0xff]   ;;  %p1281_p13 = por %p1280_p12, %p1279_p11 }
  0x3d   :  { %1007 = vmatpush3.bf16.msra.mxu0 %v1136_v6  ;;  %v1145_v15 = vld [vmem:[#allocation5 + $0x98] sm:$0xff]   ;;  %v1149_v19 = vld [vmem:[#allocation5 + $0xa0] sm:$0xff]   ;;  %v1152_v25 = vld [vmem:[#allocation5 + $0x28] sm:$0xff]  }
  0x3e   :  { %1029 = vmatpush3.bf16.msra.mxu1 %v1137_v7  ;;  %1008 = vmatprep.subr.bf16.mxu0 %v1138_v8  ;;  %v1153_v26 = vld [vmem:[#allocation5 + $0xa8] sm:$0xff]   ;;  %v1154_v27 = vld [vmem:[#allocation5 + $0x70] sm:$0xff]   ;;  %v1158_v33 = vld [vmem:[#allocation5 + $0x78] sm:$0xff]   ;;  %p1282_p0 = pnand %p1281_p13, %p1275_p10 }
  0x3f   :  { %1030 = vmatprep.subr.bf16.mxu1 %v1139_v9  ;;  %v1155_v28 = vld [vmem:[#allocation5 + $0xf0] sm:$0xff]   ;;  %v1159_v34 = vld [vmem:[#allocation5 + $0xf8] sm:$0xff]   ;;  %v1163_v41 = vld [vmem:[#allocation5 + $0x140] sm:$0xff]  }
  0x40   :  { %v1156_v31 = vld [vmem:[#allocation5 + $0x30] sm:$0xff]   ;;  %v1160_v36 = vld [vmem:[#allocation5 + $0x38] sm:$0xff]   ;;  %v1164_v42 = vld [vmem:[#allocation5 + $0x1c0] sm:$0xff]  }
  0x41   :  { %1009 = vmatpush3.bf16.msra.mxu0 %v1140_v10  ;;  %v1157_v32 = vld [vmem:[#allocation5 + $0xb0] sm:$0xff]   ;;  %v1161_v37 = vld [vmem:[#allocation5 + $0xb8] sm:$0xff]   ;;  %v1165_v46 = vld [vmem:[#allocation5 + $0x100] sm:$0xff]  }
  0x42   :  { %1031 = vmatpush3.bf16.msra.mxu1 %v1141_v11  ;;  %1010 = vmatprep.subr.bf16.mxu0 %v1142_v12  ;;  %v61_v38 = vld [vmem:[#allocation2] sm:$0xff]  ;;  %v1166_v49 = vld [vmem:[#allocation5 + $0x180] sm:$0xff]   ;;  %v1167_v51 = vld [vmem:[#allocation5 + $0x148] sm:$0xff]  }
  0x43   :  { %1032 = vmatprep.subr.bf16.mxu1 %v1143_v13  ;;  %v72_v39 = vrot.slane %v61_v38, %v1383_v35  ;;  %v65_v40 = vcombine.high %v61_v38, %v61_v38  ;;  %v1168_v53 = vld [vmem:[#allocation5 + $0x1c8] sm:$0xff]   ;;  %v1171_v56 = vld [vmem:[#allocation5 + $0x150] sm:$0xff]   ;;  %v1175_v60 = vld [vmem:[#allocation5 + $0x158] sm:$0xff]  }
  0x44   :  { %v1169_v54 = vld [vmem:[#allocation5 + $0x108] sm:$0xff]   ;;  %v1172_v57 = vld [vmem:[#allocation5 + $0x1d0] sm:$0xff]   ;;  %v1176_v61 = vld [vmem:[#allocation5 + $0x1d8] sm:$0xff]  }
  0x45   :  { %1011 = vmatpush3.bf16.msra.mxu0 %v1144_v14  ;;  %v80_v43 = vcombine.high %v72_v39, %v72_v39  ;;  %v79_v44 = vrot.slane %v65_v40, %v1383_v35  ;;  %v107_v45 = vpack.c.bf16 %v72_v39, %v72_v39  ;;  %v1170_v55 = vld [vmem:[#allocation5 + $0x188] sm:$0xff]   ;;  %v1173_v58 = vld [vmem:[#allocation5 + $0x110] sm:$0xff]   ;;  %v1177_v62 = vld [vmem:[#allocation5 + $0x118] sm:$0xff]  }
  0x46   :  { %1033 = vmatpush3.bf16.msra.mxu1 %v1145_v15  ;;  %1012 = vmatprep.subr.bf16.mxu0 %v1146_v16  ;;  %v1174_v59 = vld [vmem:[#allocation5 + $0x190] sm:$0xff]   ;;  %v1178_v63 = vld [vmem:[#allocation5 + $0x198] sm:$0xff]   ;;  %v1179_v0 = vld [vmem:[#allocation5 + $0x160] sm:$0xff]  }
  0x47   :  { %1034 = vmatprep.subr.bf16.mxu1 %v1147_v17  ;;  %v108_v47 = vpack.c.bf16 %v80_v43, %v80_v43  ;;  %v81_v48 = vcombine.high %v79_v44, %v79_v44  ;;  %v109_v50 = vpack.c.bf16 %v79_v44, %v79_v44  ;;  %v1180_v1 = vld [vmem:[#allocation5 + $0x1e0] sm:$0xff]   ;;  %v1183_v4 = vld [vmem:[#allocation5 + $0x168] sm:$0xff]   ;;  %v1187_v8 = vld [vmem:[#allocation5 + $0x170] sm:$0xff]  }
  0x48   :  { %v1181_v2 = vld [vmem:[#allocation5 + $0x120] sm:$0xff]   ;;  %v1184_v5 = vld [vmem:[#allocation5 + $0x1e8] sm:$0xff]   ;;  %v1188_v9 = vld [vmem:[#allocation5 + $0x1f0] sm:$0xff]  }
  0x49   :  { %1013 = vmatpush3.bf16.msra.mxu0 %v1148_v18  ;;  %666 = vmatprep.mubr.bf16.mxu0 %v108_v47  ;;  %v110_v52 = vpack.c.bf16 %v81_v48, %v81_v48  ;;  %v1182_v3 = vld [vmem:[#allocation5 + $0x1a0] sm:$0xff]   ;;  %v1185_v6 = vld [vmem:[#allocation5 + $0x128] sm:$0xff]   ;;  %v1189_v10 = vld [vmem:[#allocation5 + $0x130] sm:$0xff]  }
  0x4a   :  { %1035 = vmatpush3.bf16.msra.mxu1 %v1149_v19  ;;  %1014 = vmatprep.subr.bf16.mxu0 %v1150_v20  ;;  %v1186_v7 = vld [vmem:[#allocation5 + $0x1a8] sm:$0xff]   ;;  %v1190_v11 = vld [vmem:[#allocation5 + $0x1b0] sm:$0xff]   ;;  %v1191_v12 = vld [vmem:[#allocation5 + $0x178] sm:$0xff]  }
  0x4b   :  { %1036 = vmatprep.subr.bf16.mxu1 %v1151_v21  ;;  %706 = vmatprep.mubr.bf16.mxu1 %v110_v52  ;;  %v1192_v13 = vld [vmem:[#allocation5 + $0x1f8] sm:$0xff]   ;;  %v1198_v29 = vld [vmem:[#allocation7 + $0x10] sm:$0xff]  }
  0x4c   :  { %v1193_v14 = vld [vmem:[#allocation5 + $0x138] sm:$0xff]  }
  0x4d   :  { %1015 = vmatpush3.bf16.msra.mxu0 %v1152_v25  ;;  %v62_v15 = vld [vmem:[#allocation2 + $0x8] sm:$0xff] }
  0x4e   :  { %1037 = vmatpush3.bf16.msra.mxu1 %v1153_v26  ;;  %1016 = vmatprep.subr.bf16.mxu0 %v1154_v27  ;;  %v1194_v16 = vld [vmem:[#allocation5 + $0x1b8] sm:$0xff]   ;;  %v89_v17 = vrot.slane %v62_v15, %v1383_v35  ;;  %v82_v18 = vcombine.high %v62_v15, %v62_v15  ;;  %v1196_v26 = vld [vmem:[#allocation7] sm:$0xff]   ;;  %v1308_v27 = vmov 0.0  }
  0x4f   :  { %1038 = vmatprep.subr.bf16.mxu1 %v1155_v28  ;;  %v1197_v28 = vld [vmem:[#allocation7 + $0x8] sm:$0xff]   ;;  %v1199_v30 = vld [vmem:[#allocation7 + $0x18] sm:$0xff]  }
  0x50   :  { %v97_v19 = vcombine.high %v89_v17, %v89_v17  ;;  %v96_v20 = vrot.slane %v82_v18, %v1383_v35  ;;  %v111_v21 = vpack.c.bf16 %v89_v17, %v89_v17 }
  0x51   :  { %1017 = vmatpush3.bf16.msra.mxu0 %v1156_v31  ;;  %v1200_v31 = vld [vmem:[#allocation7 + $0x20] sm:$0xff]  }
  0x52   :  { %1039 = vmatpush3.bf16.msra.mxu1 %v1157_v32  ;;  %1018 = vmatprep.subr.bf16.mxu0 %v1158_v33  ;;  %v112_v22 = vpack.c.bf16 %v97_v19, %v97_v19  ;;  %v98_v23 = vcombine.high %v96_v20, %v96_v20  ;;  %v113_v24 = vpack.c.bf16 %v96_v20, %v96_v20  ;;  %v1201_v32 = vld [vmem:[#allocation7 + $0x28] sm:$0xff]   ;;  %v1202_v33 = vld [vmem:[#allocation7 + $0x30] sm:$0xff]  }
  0x53   :  { %1040 = vmatprep.subr.bf16.mxu1 %v1159_v34  ;;  %v1203_v34 = vld [vmem:[#allocation7 + $0x38] sm:$0xff]  }
  0x54   :  { %v114_v25 = vpack.c.bf16 %v98_v23, %v98_v23 }
  0x55   :  { %1019 = vmatpush3.bf16.msra.mxu0 %v1160_v36  ;;  %v930_v36 = vld [vmem:[%s1409_s2] ss:$0 sm:$0xff] }
  0x56   :  { %1041 = vmatpush3.bf16.msra.mxu1 %v1161_v37  ;;  %1048 = vmatprep.subr.bf16.mxu0 %v1163_v41 }
  0x57   :  { %1070 = vmatprep.subr.bf16.mxu1 %v1164_v42 }
  0x58   :  { %667 = vmatmul.mubr.bf16.vlgmr.msra.gmra.mrb[0].mxu0 %v107_v45 }
  0x59   :  { %1049 = vmatpush3.bf16.msra.mxu0 %v1165_v46  ;;  %707 = vmatmul.mubr.bf16.vlgmr.msra.gmra.mrb[0].mxu1 %v109_v50 }
  0x5a   :  { %1050 = vmatprep.subr.bf16.mxu0 %v1167_v51  ;;  %1071 = vmatpush3.bf16.msra.mxu1 %v1166_v49 }
  0x5b   :  { %1072 = vmatprep.subr.bf16.mxu1 %v1168_v53  ;;  %746 = vmatprep.mubr.bf16.mxu0 %v112_v22 }
  0x5c   :  { %786 = vmatprep.mubr.bf16.mxu1 %v114_v25 }
  0x5d   :  { %1051 = vmatpush3.bf16.msra.mxu0 %v1169_v54 }
  0x5e   :  { %1052 = vmatprep.subr.bf16.mxu0 %v1171_v56  ;;  %1073 = vmatpush3.bf16.msra.mxu1 %v1170_v55 }
  0x5f   :  { %1074 = vmatprep.subr.bf16.mxu1 %v1172_v57 }
  0x61   :  { %1053 = vmatpush3.bf16.msra.mxu0 %v1173_v58 }
  0x62   :  { %1054 = vmatprep.subr.bf16.mxu0 %v1175_v60  ;;  %1075 = vmatpush3.bf16.msra.mxu1 %v1174_v59 }
  0x63   :  { %1076 = vmatprep.subr.bf16.mxu1 %v1176_v61 }
  0x65   :  { %1055 = vmatpush3.bf16.msra.mxu0 %v1177_v62  ;;  %v995_v62 = vld [vmem:[%s1411_s4] ss:$0 sm:$0xff] }
  0x66   :  { %1056 = vmatprep.subr.bf16.mxu0 %v1179_v0  ;;  %1077 = vmatpush3.bf16.msra.mxu1 %v1178_v63 }
  0x67   :  { %1078 = vmatprep.subr.bf16.mxu1 %v1180_v1 }
  0x69   :  { %1057 = vmatpush3.bf16.msra.mxu0 %v1181_v2 }
  0x6a   :  { %1058 = vmatprep.subr.bf16.mxu0 %v1183_v4  ;;  %1079 = vmatpush3.bf16.msra.mxu1 %v1182_v3 }
  0x6b   :  { %1080 = vmatprep.subr.bf16.mxu1 %v1184_v5 }
  0x6d   :  { %1059 = vmatpush3.bf16.msra.mxu0 %v1185_v6 }
  0x6e   :  { %1060 = vmatprep.subr.bf16.mxu0 %v1187_v8  ;;  %1081 = vmatpush3.bf16.msra.mxu1 %v1186_v7 }
  0x6f   :  { %1082 = vmatprep.subr.bf16.mxu1 %v1188_v9 }
  0x71   :  { %1061 = vmatpush3.bf16.msra.mxu0 %v1189_v10 }
  0x72   :  { %1062 = vmatprep.subr.bf16.mxu0 %v1191_v12  ;;  %1083 = vmatpush3.bf16.msra.mxu1 %v1190_v11 }
  0x73   :  { %1084 = vmatprep.subr.bf16.mxu1 %v1192_v13 }
  0x75   :  { %1063 = vmatpush3.bf16.msra.mxu0 %v1193_v14 }
  0x76   :  { %1085 = vmatpush3.bf16.msra.mxu1 %v1194_v16  ;;  %1101 = vmatprep.subr.bf16.mxu0 %v1308_v27 }
  0x78   :  { %747 = vmatmul.mubr.bf16.vlgmr.msra.gmra.mrb[4].mxu0 %v111_v21 }
  0x79   :  { %787 = vmatmul.mubr.bf16.vlgmr.msra.gmra.mrb[4].mxu1 %v113_v24  ;;  %1102 = vmatpush3.bf16.msra.mxu0 %v1196_v26 }
  0x7a   :  { %1103 = vmatprep.subr.bf16.mxu0 %v1308_v27  ;;  %1117 = vmatprep.mubr.msk.bf16.mxu0 %vm1309_vm0, %v1308_v27 }
  0x7d   :  { %1104 = vmatpush3.bf16.msra.mxu0 %v1197_v28 }
  0x7e   :  { %1105 = vmatprep.subr.bf16.mxu0 %v1308_v27 }
  0x81   :  { %1106 = vmatpush3.bf16.msra.mxu0 %v1198_v29 }
  0x82   :  { %1107 = vmatprep.subr.bf16.mxu0 %v1308_v27 }
  0x85   :  { %1108 = vmatpush3.bf16.msra.mxu0 %v1199_v30 }
  0x86   :  { %1109 = vmatprep.subr.bf16.mxu0 %v1308_v27 }
  0x89   :  { %1110 = vmatpush3.bf16.msra.mxu0 %v1200_v31 }
  0x8a   :  { %1111 = vmatprep.subr.bf16.mxu0 %v1308_v27 }
  0x8d   :  { %1112 = vmatpush3.bf16.msra.mxu0 %v1201_v32 }
  0x8e   :  { %1113 = vmatprep.subr.bf16.mxu0 %v1308_v27 }
  0x91   :  { %1114 = vmatpush3.bf16.msra.mxu0 %v1202_v33 }
  0x92   :  { %1115 = vmatprep.subr.bf16.mxu0 %v1308_v27 }
  0x95   :  { %1116 = vmatpush3.bf16.msra.mxu0 %v1203_v34 }
 0x12b   :  { %v1020_v35 = vpop.f32.mrb[0].mxu0 }
 0x12c   :  { %v1021_v37 = vpop.f32.mrb[1].mxu0  ;;  %v1042_v38 = vpop.f32.mrb[0].mxu1 }
 0x12d   :  { %v1022_v39 = vadd.f32 %v1021_v37, %v1020_v35  ;;  %v1023_v40 = vpop.f32.mrb[2].mxu0  ;;  %v1043_v41 = vpop.f32.mrb[1].mxu1 }
 0x12e   :  { %v1024_v42 = vpop.f32.mrb[3].mxu0  ;;  %v1044_v44 = vadd.f32 %v1043_v41, %v1042_v38  ;;  %v1045_v45 = vpop.f32.mrb[2].mxu1 }
 0x12f   :  { %v669_v43 = vadd.f32 %v1022_v39, %v930_v36  ;;  %v1046_v46 = vpop.f32.mrb[3].mxu1 }
 0x131   :  { %v709_v47 = vadd.f32 %v1044_v44, %v669_v43 }
 0x14b   :  { %v1064_v48 = vpop.f32.mrb[4].mxu0 }
 0x14c   :  { %v1065_v49 = vpop.f32.mrb[5].mxu0  ;;  %v1086_v50 = vpop.f32.mrb[4].mxu1 }
 0x14d   :  { %v1066_v51 = vadd.f32 %v1065_v49, %v1064_v48  ;;  %v1067_v52 = vpop.f32.mrb[6].mxu0  ;;  %v1087_v53 = vpop.f32.mrb[5].mxu1 }
 0x14e   :  { %v1068_v54 = vpop.f32.mrb[7].mxu0  ;;  %v1088_v56 = vadd.f32 %v1087_v53, %v1086_v50  ;;  %v1089_v57 = vpop.f32.mrb[6].mxu1 }
 0x14f   :  { %v749_v55 = vadd.f32 %v1066_v51, %v709_v47  ;;  %v1090_v58 = vpop.f32.mrb[7].mxu1 }
 0x151   :  { %v789_v59 = vadd.f32 %v1088_v56, %v749_v55 }
 0x153   :  { %v794_v60 = vmax.f32 %v789_v59, 0.0 }
 0x155   :  { %v795_v61 = vpack.c.bf16 %v794_v60, %v794_v60 }
 0x157   :  { %1118 = vmatmul.mubr.bf16.vlgmr.msra.gmra.mrb[8].mxu0 %v795_v61 }
 0x22a   :  { %v901_v63 = vpop.f32.mrb[8].mxu0 }
 0x22b   :  { %v902_v0 = vadd.f32 %v995_v62, %v901_v63  ;;  %v1119_v1 = vpop.f32.mrb[9].mxu0 }
 0x22c   :  { %v904_v2 = vpop.f32.mrb[10].mxu0 }
 0x22d   :  { %v907_v3 = vsub.f32 0.0, %v902_v0  ;;  %v1120_v4 = vpop.f32.mrb[11].mxu0 }
 0x22f   :  { %v908_v5 = vmul.f32 1.442695, %v907_v3 }
 0x231   :  { %1204 = vpow2.f32 %v908_v5 }
 0x23b   :  { %v1205_v6 = vpop.eup %1204 }
 0x23c   :  { %v910_v7 = vadd.f32 1.0, %v1205_v6 }
 0x23e   :  { %1206 = vrcp.f32 %v910_v7 }
 0x248   :  { %v1207_v8 = vpop.eup %1206 }
 0x249   :  { %913 = vst.msk [vmem:[#allocation8] sm:$0x3] %vm912_vm1, %v1207_v8 }
 0x24a   :  { %1285 = shalt.err (!%p1282_p0)
}
 0x24b   :  { %s1286_s10 = scalar_lea.hbm %s1412_s5, 32 }
 0x24c   :  { %p1287_p1 = scmp.ne.s32.totalorder %s1412_s5, %s1286_s10  ;;  %p1290_p2 = scmp.lt.u32.totalorder %s1286_s10, %s1412_s5 }
 0x24e   :  { %p1292_p3 = pnand %p1290_p2, %p1287_p1 }
 0x250   :  { %1295 = shalt.err (!%p1292_p3)
}
 0x251   :  { %923 = dma.vmem_to_hbm [thread:$0]  %s921_s7, 32, %s1412_s5, [#allocation4]  }
 0x252   :  { %1300 = dma.done.wait [#allocation4], 32  }
 0x253   :  { %1301 = vsyncadd [#allocation4], 4294967264 }
 0x254   :  { %927 = vsyncpa [#allocation3], 1 }
 0x255   :  { %928 = vsyncpa [#allocation6], 1 }
 0x256   :  { %929 = vsyncpa [#allocation4], 1 }

</bundles_post_ra>
